<compile_context>
chip_gen: v5e
topology: v5e:2x2
jax: 0.10.0
libtpu: 0.0.40
codegen_flags: <defaults>
</compile_context>

<pallas_src>
import jax
import jax.numpy as jnp
from jax import lax
from jax.experimental import pallas as pl
from jax.experimental.pallas import tpu as pltpu  # noqa: F401  (TPU backend)

H_PAD = 128                   # hidden channels padded to full lane width
E_PAD = 128                   # label edges padded to full lane width
MXU_DTYPE = jnp.bfloat16      # matmul-operand dtype (jnp.float32 for exactness)


# ---------------------------------------------------------------------------
# helpers
# ---------------------------------------------------------------------------
def _round_up(n, m):
    return ((n + m - 1) // m) * m


def _pad2(a, rows, cols, dtype=jnp.float32):
    a = jnp.asarray(a, jnp.float32)
    return jnp.pad(a, ((0, rows - a.shape[0]), (0, cols - a.shape[1]))).astype(dtype)


def build_mean_adj(src_idx, dst_idx, n_src, n_dst):
    """Dense mean-aggregation matrix: A[d, s] = multiplicity(s->d) / in_deg(d)."""
    a = jnp.zeros((n_dst, n_src), jnp.float32).at[dst_idx, src_idx].add(1.0)
    deg = jnp.maximum(a.sum(axis=1, keepdims=True), 1.0)
    return a / deg


# ---------------------------------------------------------------------------
# single fused Pallas kernel: encoders -> 2 hetero SAGE layers -> classifier
# ---------------------------------------------------------------------------
def _fused_kernel(x_ref,        # [2, N_PAD, F_PAD]   (country, product) feats
                  enc_w_ref,    # [2, F_PAD, H_PAD]   encoder Linear weights
                  emb_ref,      # [2, N_PAD, H_PAD]   embeddings (+ enc bias)
                  adj_ref,      # [2, N_PAD, N_PAD]   (a_pc, a_cp) mean adj
                  conv_w_ref,   # [8, H_PAD, H_PAD]   4 convs x (wl, wr)
                  conv_b_ref,   # [8, H_PAD]          rows 0..3 = conv biases
                  s_ref,        # [2, E_PAD, N_PAD]   one-hot gathers (c, p)
                  out_ref):     # [8, E_PAD]          lane-dense scores
    f32 = jnp.float32
    mx = MXU_DTYPE

    def dot(a, b):
        return jnp.dot(a, b, preferred_element_type=f32)

    b_all = conv_b_ref[...]                                   # (8, H_PAD) f32

    # node encoders: Linear(x) + Embedding(node_id)  (Linear bias pre-folded
    # into emb so zero-padded node rows stay exactly zero here).
    x_c = dot(x_ref[0], enc_w_ref[0]) + emb_ref[0]
    x_p = dot(x_ref[1], enc_w_ref[1]) + emb_ref[1]

    # SAGEConv: mean aggregation (dense adj matmul) + two separate HxH
    # projections -- no lane-dim concat / packed weight.
    def sage(adj, xs, xd, wl, wr, b, relu):
        agg = dot(adj, xs.astype(mx))
        out = dot(agg.astype(mx), wl) + dot(xd.astype(mx), wr) + b
        return jnp.maximum(out, 0.0) if relu else out

    adj_pc = adj_ref[0]    # product -> country (reverse edge type)
    adj_cp = adj_ref[1]    # country -> product

    # to_hetero(GNN): layer 1 (+ReLU), layer 2 (no activation).
    # NOTE: the bias broadcast writes relu(b) into padded node rows, but those
    # rows are never read (padded adjacency cols and one-hot cols are zero).
    h_c = sage(adj_pc, x_p, x_c, conv_w_ref[0], conv_w_ref[1], b_all[0:1], True)
    h_p = sage(adj_cp, x_c, x_p, conv_w_ref[2], conv_w_ref[3], b_all[1:2], True)
    z_c = sage(adj_pc, h_p, h_c, conv_w_ref[4], conv_w_ref[5], b_all[2:3], False)
    z_p = sage(adj_cp, h_c, h_p, conv_w_ref[6], conv_w_ref[7], b_all[3:4], False)

    # classifier: gather edge endpoints via one-hot matmuls, per-edge dot.
    f_c = dot(s_ref[0], z_c.astype(mx))                       # (E_PAD, H_PAD)
    f_p = dot(s_ref[1], z_p.astype(mx))
    prod = f_c * f_p                                          # f32
    # lane-axis contraction on the MXU (no prod.T / XLU transpose):
    # (8, H_PAD) x (E_PAD, H_PAD) --contract H--> (8, E_PAD); every row of the
    # output slab carries the per-edge scores (lane-dense store).
    ones8 = jnp.ones((8, prod.shape[1]), f32)
    out_ref[...] = lax.dot_general(
        ones8, prod, dimension_numbers=(((1,), (1,)), ((), ())),
        preferred_element_type=f32)


# ---------------------------------------------------------------------------
# host-side one-time prep: pad, pack and stack all operands (7 DMAs total)
# ---------------------------------------------------------------------------
def prepare_operands(params, x_country, x_product, nid_c, nid_p,
                     edge_index, edge_label_index):
    nc, npr = x_country.shape[0], x_product.shape[0]
    fc, fp = x_country.shape[1], x_product.shape[1]
    n_pad = max(_round_up(nc, 8), _round_up(npr, 8))
    f_pad = _round_up(max(fc, fp), 8)     # contraction dim: multiple of 8 only
    e = edge_label_index.shape[1]
    mx = MXU_DTYPE

    # node features (pure matmul operands -> MXU dtype)
    x_stack = jnp.stack([_pad2(x_country, n_pad, f_pad, mx),
                         _pad2(x_product, n_pad, f_pad, mx)])
    enc_w = jnp.stack([_pad2(params["country_lin_w"], f_pad, H_PAD, mx),
                       _pad2(params["product_lin_w"], f_pad, H_PAD, mx)])

    # embeddings with the encoder Linear bias pre-folded (f32, added post-MXU)
    emb_c = params["country_emb"][nid_c] + params["country_lin_b"]
    emb_p = params["product_emb"][nid_p] + params["product_lin_b"]
    emb_stack = jnp.stack([_pad2(emb_c, n_pad, H_PAD),
                           _pad2(emb_p, n_pad, H_PAD)])

    # dense mean-aggregation matrices at padded size (padded rows/cols are 0)
    a_pc = build_mean_adj(edge_index[1], edge_index[0], n_pad, n_pad)
    a_cp = build_mean_adj(edge_index[0], edge_index[1], n_pad, n_pad)
    adj_stack = jnp.stack([a_pc, a_cp]).astype(mx)

    # SAGEConv weights (one [8, H, H] stack) and biases (one [8, H] slab)
    order = ("l1_pc", "l1_cp", "l2_pc", "l2_cp")
    conv_w = jnp.stack([_pad2(params[f"{n}_{side}"], H_PAD, H_PAD, mx)
                        for n in order for side in ("wl", "wr")])
    conv_b = jnp.concatenate(
        [_pad2(params[f"{n}_b"], 1, H_PAD) for n in order]
        + [jnp.zeros((4, H_PAD), jnp.float32)], axis=0)

    # classifier one-hot gather matrices (0/1 are exact in bf16)
    s_c = jnp.zeros((E_PAD, n_pad), jnp.float32).at[
        jnp.arange(e), edge_label_index[0]].set(1.0)
    s_p = jnp.zeros((E_PAD, n_pad), jnp.float32).at[
        jnp.arange(e), edge_label_index[1]].set(1.0)
    s_stack = jnp.stack([s_c, s_p]).astype(mx)

    return (x_stack, enc_w, emb_stack, adj_stack, conv_w, conv_b, s_stack), e


@jax.jit
def fused_forward(x_stack, enc_w, emb_stack, adj_stack, conv_w, conv_b, s_stack):
    operands = (x_stack, enc_w, emb_stack, adj_stack, conv_w, conv_b, s_stack)
    return pl.pallas_call(
        _fused_kernel,
        out_shape=jax.ShapeDtypeStruct((8, E_PAD), jnp.float32),
        in_specs=[pl.BlockSpec(tuple(o.shape),
                               lambda *a, _n=len(o.shape): (0,) * _n)
                  for o in operands],
        out_specs=pl.BlockSpec((8, E_PAD), lambda: (0, 0)),
    )(*operands)


def model_forward(params, x_country, x_product, nid_c, nid_p,
                  edge_index, edge_label_index):
    operands, e = prepare_operands(params, x_country, x_product, nid_c, nid_p,
                                   edge_index, edge_label_index)
    out = fused_forward(*operands)
    return out[0, :e]


# ---------------------------------------------------------------------------
# pure-JAX f32 reference
# ---------------------------------------------------------------------------
def reference_forward(params, x_country, x_product, nid_c, nid_p,
                      edge_index, edge_label_index):
    x_c = (x_country @ params["country_lin_w"] + params["country_lin_b"]
           + params["country_emb"][nid_c])
    x_p = (x_product @ params["product_lin_w"] + params["product_lin_b"]
           + params["product_emb"][nid_p])
    a_cp = build_mean_adj(edge_index[0], edge_index[1], x_c.shape[0], x_p.shape[0])
    a_pc = build_mean_adj(edge_index[1], edge_index[0], x_p.shape[0], x_c.shape[0])

    def sage(adj, xs, xd, name, relu):
        out = (adj @ xs @ params[f"{name}_wl"] + xd @ params[f"{name}_wr"]
               + params[f"{name}_b"])
        return jnp.maximum(out, 0.0) if relu else out

    h_c = sage(a_pc, x_p, x_c, "l1_pc", True)
    h_p = sage(a_cp, x_c, x_p, "l1_cp", True)
    z_c = sage(a_pc, h_p, h_c, "l2_pc", False)
    z_p = sage(a_cp, h_c, h_p, "l2_cp", False)
    return jnp.sum(z_c[edge_label_index[0]] * z_p[edge_label_index[1]], axis=-1)


# ---------------------------------------------------------------------------
# deterministic parameter init (synthetic weights, shapes from __init__)
# ---------------------------------------------------------------------------
def init_params(key, hidden, num_countries, num_products):
    keys = jax.random.split(key, 18)

    def nrm(k, shape, scale=0.1):
        return jax.random.normal(k, shape, jnp.float32) * scale

    p = {
        "country_lin_w": nrm(keys[0], (num_countries, hidden)),
        "country_lin_b": nrm(keys[1], (1, hidden)),
        "product_lin_w": nrm(keys[2], (num_products, hidden)),
        "product_lin_b": nrm(keys[3], (1, hidden)),
        "country_emb":   nrm(keys[4], (num_countries, hidden)),
        "product_emb":   nrm(keys[5], (num_products, hidden)),
    }
    i = 6
    for name in ("l1_cp", "l1_pc", "l2_cp", "l2_pc"):   # SAGEConv per edge type/layer
        p[f"{name}_wl"] = nrm(keys[i], (hidden, hidden)); i += 1
        p[f"{name}_wr"] = nrm(keys[i], (hidden, hidden)); i += 1
        p[f"{name}_b"] = nrm(keys[i], (1, hidden)); i += 1
    return p
    # TODO(synk): `self.predictor` (Sequential) is only used in predict_pair(),
    # not in forward(), so it is not translated.


# ---------------------------------------------------------------------------
if __name__ == "__main__":
    HIDDEN = 32
    NUM_COUNTRIES = 8     # country node count == embedding table size
    NUM_PRODUCTS = 12     # product node count == embedding table size
    NUM_EDGES = 24
    NUM_LABEL_EDGES = 10

    key = jax.random.PRNGKey(0)
    k_xc, k_xp, k_e0, k_e1, k_l0, k_l1, k_par = jax.random.split(key, 7)

    x_country = jax.random.normal(k_xc, (NUM_COUNTRIES, NUM_COUNTRIES), jnp.float32)
    x_product = jax.random.normal(k_xp, (NUM_PRODUCTS, NUM_PRODUCTS), jnp.float32)
    node_id_country = jnp.arange(NUM_COUNTRIES, dtype=jnp.int32)
    node_id_product = jnp.arange(NUM_PRODUCTS, dtype=jnp.int32)
    edge_index = jnp.stack([
        jax.random.randint(k_e0, (NUM_EDGES,), 0, NUM_COUNTRIES),
        jax.random.randint(k_e1, (NUM_EDGES,), 0, NUM_PRODUCTS),
    ]).astype(jnp.int32)
    edge_label_index = jnp.stack([
        jax.random.randint(k_l0, (NUM_LABEL_EDGES,), 0, NUM_COUNTRIES),
        jax.random.randint(k_l1, (NUM_LABEL_EDGES,), 0, NUM_PRODUCTS),
    ]).astype(jnp.int32)

    params = init_params(k_par, HIDDEN, NUM_COUNTRIES, NUM_PRODUCTS)

    pred = model_forward(params, x_country, x_product, node_id_country,
                         node_id_product, edge_index, edge_label_index)
    pred = jax.block_until_ready(pred)

    ref = reference_forward(params, x_country, x_product, node_id_country,
                            node_id_product, edge_index, edge_label_index)
    assert pred.shape == (NUM_LABEL_EDGES,)
    tol = 1e-4 if MXU_DTYPE == jnp.float32 else 5e-2   # bf16 MXU operands
    assert jnp.allclose(pred, ref, atol=tol, rtol=tol), (pred, ref)
    print("KERNEL_OK")
</pallas_src>

<mosaic_0001>
module attributes {stable_mosaic.version = 11 : i64} {
  func.func @_fused_kernel(%arg0: memref<2x16x16xbf16, #tpu.memory_space<vmem>>, %arg1: memref<2x16x128xbf16, #tpu.memory_space<vmem>>, %arg2: memref<2x16x128xf32, #tpu.memory_space<vmem>>, %arg3: memref<2x16x16xbf16, #tpu.memory_space<vmem>>, %arg4: memref<8x128x128xbf16, #tpu.memory_space<vmem>>, %arg5: memref<8x128xf32, #tpu.memory_space<vmem>>, %arg6: memref<2x128x16xbf16, #tpu.memory_space<vmem>>, %arg7: memref<8x128xf32, #tpu.memory_space<vmem>>) attributes {dimension_semantics = [], scalar_prefetch = 0 : i64, scratch_operands = 0 : i64, tpu.core_type = #tpu.core_type<tc>} {
    %c0 = arith.constant 0 : index
    %c0_0 = arith.constant 0 : index
    %0 = vector.load %arg5[%c0, %c0_0] : memref<8x128xf32, #tpu.memory_space<vmem>>, vector<8x128xf32>
    %c0_1 = arith.constant 0 : index
    %c0_2 = arith.constant 0 : index
    %c0_3 = arith.constant 0 : index
    %1 = vector.load %arg0[%c0_1, %c0_2, %c0_3] : memref<2x16x16xbf16, #tpu.memory_space<vmem>>, vector<1x16x16xbf16>
    %2 = vector.shape_cast %1 : vector<1x16x16xbf16> to vector<16x16xbf16>
    %c0_4 = arith.constant 0 : index
    %c0_5 = arith.constant 0 : index
    %c0_6 = arith.constant 0 : index
    %3 = vector.load %arg1[%c0_4, %c0_5, %c0_6] : memref<2x16x128xbf16, #tpu.memory_space<vmem>>, vector<1x16x128xbf16>
    %4 = vector.shape_cast %3 : vector<1x16x128xbf16> to vector<16x128xbf16>
    %cst = arith.constant dense<0.000000e+00> : vector<16x128xf32>
    %5 = tpu.matmul %2, %4, %cst {dimension_numbers = #tpu.dot_dimension_numbers<[1], [0], [0], [1], [0, 0, 1, 1], [], []>} : vector<16x16xbf16>, vector<16x128xbf16>, vector<16x128xf32> -> vector<16x128xf32>
    %c0_7 = arith.constant 0 : index
    %c0_8 = arith.constant 0 : index
    %c0_9 = arith.constant 0 : index
    %6 = vector.load %arg2[%c0_7, %c0_8, %c0_9] : memref<2x16x128xf32, #tpu.memory_space<vmem>>, vector<1x16x128xf32>
    %7 = vector.shape_cast %6 : vector<1x16x128xf32> to vector<16x128xf32>
    %8 = arith.addf %5, %7 : vector<16x128xf32>
    %c1 = arith.constant 1 : index
    %c0_10 = arith.constant 0 : index
    %c0_11 = arith.constant 0 : index
    %9 = vector.load %arg0[%c1, %c0_10, %c0_11] : memref<2x16x16xbf16, #tpu.memory_space<vmem>>, vector<1x16x16xbf16>
    %10 = vector.shape_cast %9 : vector<1x16x16xbf16> to vector<16x16xbf16>
    %c1_12 = arith.constant 1 : index
    %c0_13 = arith.constant 0 : index
    %c0_14 = arith.constant 0 : index
    %11 = vector.load %arg1[%c1_12, %c0_13, %c0_14] : memref<2x16x128xbf16, #tpu.memory_space<vmem>>, vector<1x16x128xbf16>
    %12 = vector.shape_cast %11 : vector<1x16x128xbf16> to vector<16x128xbf16>
    %cst_15 = arith.constant dense<0.000000e+00> : vector<16x128xf32>
    %13 = tpu.matmul %10, %12, %cst_15 {dimension_numbers = #tpu.dot_dimension_numbers<[1], [0], [0], [1], [0, 0, 1, 1], [], []>} : vector<16x16xbf16>, vector<16x128xbf16>, vector<16x128xf32> -> vector<16x128xf32>
    %c1_16 = arith.constant 1 : index
    %c0_17 = arith.constant 0 : index
    %c0_18 = arith.constant 0 : index
    %14 = vector.load %arg2[%c1_16, %c0_17, %c0_18] : memref<2x16x128xf32, #tpu.memory_space<vmem>>, vector<1x16x128xf32>
    %15 = vector.shape_cast %14 : vector<1x16x128xf32> to vector<16x128xf32>
    %16 = arith.addf %13, %15 : vector<16x128xf32>
    %c0_19 = arith.constant 0 : index
    %c0_20 = arith.constant 0 : index
    %c0_21 = arith.constant 0 : index
    %17 = vector.load %arg3[%c0_19, %c0_20, %c0_21] : memref<2x16x16xbf16, #tpu.memory_space<vmem>>, vector<1x16x16xbf16>
    %18 = vector.shape_cast %17 : vector<1x16x16xbf16> to vector<16x16xbf16>
    %c1_22 = arith.constant 1 : index
    %c0_23 = arith.constant 0 : index
    %c0_24 = arith.constant 0 : index
    %19 = vector.load %arg3[%c1_22, %c0_23, %c0_24] : memref<2x16x16xbf16, #tpu.memory_space<vmem>>, vector<1x16x16xbf16>
    %20 = vector.shape_cast %19 : vector<1x16x16xbf16> to vector<16x16xbf16>
    %c0_25 = arith.constant 0 : index
    %c0_26 = arith.constant 0 : index
    %c0_27 = arith.constant 0 : index
    %21 = vector.load %arg4[%c0_25, %c0_26, %c0_27] : memref<8x128x128xbf16, #tpu.memory_space<vmem>>, vector<1x128x128xbf16>
    %22 = vector.shape_cast %21 : vector<1x128x128xbf16> to vector<128x128xbf16>
    %c1_28 = arith.constant 1 : index
    %c0_29 = arith.constant 0 : index
    %c0_30 = arith.constant 0 : index
    %23 = vector.load %arg4[%c1_28, %c0_29, %c0_30] : memref<8x128x128xbf16, #tpu.memory_space<vmem>>, vector<1x128x128xbf16>
    %24 = vector.shape_cast %23 : vector<1x128x128xbf16> to vector<128x128xbf16>
    %25 = vector.extract_strided_slice %0 {offsets = [0, 0], sizes = [1, 128], strides = [1, 1]} : vector<8x128xf32> to vector<1x128xf32>
    %26 = arith.truncf %16 : vector<16x128xf32> to vector<16x128xbf16>
    %cst_31 = arith.constant dense<0.000000e+00> : vector<16x128xf32>
    %27 = tpu.matmul %18, %26, %cst_31 {dimension_numbers = #tpu.dot_dimension_numbers<[1], [0], [0], [1], [0, 0, 1, 1], [], []>} : vector<16x16xbf16>, vector<16x128xbf16>, vector<16x128xf32> -> vector<16x128xf32>
    %28 = arith.truncf %27 : vector<16x128xf32> to vector<16x128xbf16>
    %cst_32 = arith.constant dense<0.000000e+00> : vector<16x128xf32>
    %29 = tpu.matmul %28, %22, %cst_32 {dimension_numbers = #tpu.dot_dimension_numbers<[1], [0], [0], [1], [0, 0, 1, 1], [], []>} : vector<16x128xbf16>, vector<128x128xbf16>, vector<16x128xf32> -> vector<16x128xf32>
    %30 = arith.truncf %8 : vector<16x128xf32> to vector<16x128xbf16>
    %cst_33 = arith.constant dense<0.000000e+00> : vector<16x128xf32>
    %31 = tpu.matmul %30, %24, %cst_33 {dimension_numbers = #tpu.dot_dimension_numbers<[1], [0], [0], [1], [0, 0, 1, 1], [], []>} : vector<16x128xbf16>, vector<128x128xbf16>, vector<16x128xf32> -> vector<16x128xf32>
    %32 = arith.addf %29, %31 : vector<16x128xf32>
    %33 = vector.broadcast %25 : vector<1x128xf32> to vector<16x128xf32>
    %34 = arith.addf %32, %33 : vector<16x128xf32>
    %cst_34 = arith.constant 0.000000e+00 : f32
    %35 = vector.broadcast %cst_34 : f32 to vector<16x128xf32>
    %36 = arith.maximumf %34, %35 : vector<16x128xf32>
    %c2 = arith.constant 2 : index
    %c0_35 = arith.constant 0 : index
    %c0_36 = arith.constant 0 : index
    %37 = vector.load %arg4[%c2, %c0_35, %c0_36] : memref<8x128x128xbf16, #tpu.memory_space<vmem>>, vector<1x128x128xbf16>
    %38 = vector.shape_cast %37 : vector<1x128x128xbf16> to vector<128x128xbf16>
    %c3 = arith.constant 3 : index
    %c0_37 = arith.constant 0 : index
    %c0_38 = arith.constant 0 : index
    %39 = vector.load %arg4[%c3, %c0_37, %c0_38] : memref<8x128x128xbf16, #tpu.memory_space<vmem>>, vector<1x128x128xbf16>
    %40 = vector.shape_cast %39 : vector<1x128x128xbf16> to vector<128x128xbf16>
    %41 = vector.extract_strided_slice %0 {offsets = [1, 0], sizes = [1, 128], strides = [1, 1]} : vector<8x128xf32> to vector<1x128xf32>
    %42 = arith.truncf %8 : vector<16x128xf32> to vector<16x128xbf16>
    %cst_39 = arith.constant dense<0.000000e+00> : vector<16x128xf32>
    %43 = tpu.matmul %20, %42, %cst_39 {dimension_numbers = #tpu.dot_dimension_numbers<[1], [0], [0], [1], [0, 0, 1, 1], [], []>} : vector<16x16xbf16>, vector<16x128xbf16>, vector<16x128xf32> -> vector<16x128xf32>
    %44 = arith.truncf %43 : vector<16x128xf32> to vector<16x128xbf16>
    %cst_40 = arith.constant dense<0.000000e+00> : vector<16x128xf32>
    %45 = tpu.matmul %44, %38, %cst_40 {dimension_numbers = #tpu.dot_dimension_numbers<[1], [0], [0], [1], [0, 0, 1, 1], [], []>} : vector<16x128xbf16>, vector<128x128xbf16>, vector<16x128xf32> -> vector<16x128xf32>
    %46 = arith.truncf %16 : vector<16x128xf32> to vector<16x128xbf16>
    %cst_41 = arith.constant dense<0.000000e+00> : vector<16x128xf32>
    %47 = tpu.matmul %46, %40, %cst_41 {dimension_numbers = #tpu.dot_dimension_numbers<[1], [0], [0], [1], [0, 0, 1, 1], [], []>} : vector<16x128xbf16>, vector<128x128xbf16>, vector<16x128xf32> -> vector<16x128xf32>
    %48 = arith.addf %45, %47 : vector<16x128xf32>
    %49 = vector.broadcast %41 : vector<1x128xf32> to vector<16x128xf32>
    %50 = arith.addf %48, %49 : vector<16x128xf32>
    %cst_42 = arith.constant 0.000000e+00 : f32
    %51 = vector.broadcast %cst_42 : f32 to vector<16x128xf32>
    %52 = arith.maximumf %50, %51 : vector<16x128xf32>
    %c4 = arith.constant 4 : index
    %c0_43 = arith.constant 0 : index
    %c0_44 = arith.constant 0 : index
    %53 = vector.load %arg4[%c4, %c0_43, %c0_44] : memref<8x128x128xbf16, #tpu.memory_space<vmem>>, vector<1x128x128xbf16>
    %54 = vector.shape_cast %53 : vector<1x128x128xbf16> to vector<128x128xbf16>
    %c5 = arith.constant 5 : index
    %c0_45 = arith.constant 0 : index
    %c0_46 = arith.constant 0 : index
    %55 = vector.load %arg4[%c5, %c0_45, %c0_46] : memref<8x128x128xbf16, #tpu.memory_space<vmem>>, vector<1x128x128xbf16>
    %56 = vector.shape_cast %55 : vector<1x128x128xbf16> to vector<128x128xbf16>
    %57 = vector.extract_strided_slice %0 {offsets = [2, 0], sizes = [1, 128], strides = [1, 1]} : vector<8x128xf32> to vector<1x128xf32>
    %58 = arith.truncf %52 : vector<16x128xf32> to vector<16x128xbf16>
    %cst_47 = arith.constant dense<0.000000e+00> : vector<16x128xf32>
    %59 = tpu.matmul %18, %58, %cst_47 {dimension_numbers = #tpu.dot_dimension_numbers<[1], [0], [0], [1], [0, 0, 1, 1], [], []>} : vector<16x16xbf16>, vector<16x128xbf16>, vector<16x128xf32> -> vector<16x128xf32>
    %60 = arith.truncf %59 : vector<16x128xf32> to vector<16x128xbf16>
    %cst_48 = arith.constant dense<0.000000e+00> : vector<16x128xf32>
    %61 = tpu.matmul %60, %54, %cst_48 {dimension_numbers = #tpu.dot_dimension_numbers<[1], [0], [0], [1], [0, 0, 1, 1], [], []>} : vector<16x128xbf16>, vector<128x128xbf16>, vector<16x128xf32> -> vector<16x128xf32>
    %62 = arith.truncf %36 : vector<16x128xf32> to vector<16x128xbf16>
    %cst_49 = arith.constant dense<0.000000e+00> : vector<16x128xf32>
    %63 = tpu.matmul %62, %56, %cst_49 {dimension_numbers = #tpu.dot_dimension_numbers<[1], [0], [0], [1], [0, 0, 1, 1], [], []>} : vector<16x128xbf16>, vector<128x128xbf16>, vector<16x128xf32> -> vector<16x128xf32>
    %64 = arith.addf %61, %63 : vector<16x128xf32>
    %65 = vector.broadcast %57 : vector<1x128xf32> to vector<16x128xf32>
    %66 = arith.addf %64, %65 : vector<16x128xf32>
    %c6 = arith.constant 6 : index
    %c0_50 = arith.constant 0 : index
    %c0_51 = arith.constant 0 : index
    %67 = vector.load %arg4[%c6, %c0_50, %c0_51] : memref<8x128x128xbf16, #tpu.memory_space<vmem>>, vector<1x128x128xbf16>
    %68 = vector.shape_cast %67 : vector<1x128x128xbf16> to vector<128x128xbf16>
    %c7 = arith.constant 7 : index
    %c0_52 = arith.constant 0 : index
    %c0_53 = arith.constant 0 : index
    %69 = vector.load %arg4[%c7, %c0_52, %c0_53] : memref<8x128x128xbf16, #tpu.memory_space<vmem>>, vector<1x128x128xbf16>
    %70 = vector.shape_cast %69 : vector<1x128x128xbf16> to vector<128x128xbf16>
    %71 = vector.extract_strided_slice %0 {offsets = [3, 0], sizes = [1, 128], strides = [1, 1]} : vector<8x128xf32> to vector<1x128xf32>
    %72 = arith.truncf %36 : vector<16x128xf32> to vector<16x128xbf16>
    %cst_54 = arith.constant dense<0.000000e+00> : vector<16x128xf32>
    %73 = tpu.matmul %20, %72, %cst_54 {dimension_numbers = #tpu.dot_dimension_numbers<[1], [0], [0], [1], [0, 0, 1, 1], [], []>} : vector<16x16xbf16>, vector<16x128xbf16>, vector<16x128xf32> -> vector<16x128xf32>
    %74 = arith.truncf %73 : vector<16x128xf32> to vector<16x128xbf16>
    %cst_55 = arith.constant dense<0.000000e+00> : vector<16x128xf32>
    %75 = tpu.matmul %74, %68, %cst_55 {dimension_numbers = #tpu.dot_dimension_numbers<[1], [0], [0], [1], [0, 0, 1, 1], [], []>} : vector<16x128xbf16>, vector<128x128xbf16>, vector<16x128xf32> -> vector<16x128xf32>
    %76 = arith.truncf %52 : vector<16x128xf32> to vector<16x128xbf16>
    %cst_56 = arith.constant dense<0.000000e+00> : vector<16x128xf32>
    %77 = tpu.matmul %76, %70, %cst_56 {dimension_numbers = #tpu.dot_dimension_numbers<[1], [0], [0], [1], [0, 0, 1, 1], [], []>} : vector<16x128xbf16>, vector<128x128xbf16>, vector<16x128xf32> -> vector<16x128xf32>
    %78 = arith.addf %75, %77 : vector<16x128xf32>
    %79 = vector.broadcast %71 : vector<1x128xf32> to vector<16x128xf32>
    %80 = arith.addf %78, %79 : vector<16x128xf32>
    %c0_57 = arith.constant 0 : index
    %c0_58 = arith.constant 0 : index
    %c0_59 = arith.constant 0 : index
    %81 = vector.load %arg6[%c0_57, %c0_58, %c0_59] : memref<2x128x16xbf16, #tpu.memory_space<vmem>>, vector<1x128x16xbf16>
    %82 = vector.shape_cast %81 : vector<1x128x16xbf16> to vector<128x16xbf16>
    %83 = arith.truncf %66 : vector<16x128xf32> to vector<16x128xbf16>
    %cst_60 = arith.constant dense<0.000000e+00> : vector<128x128xf32>
    %84 = tpu.matmul %82, %83, %cst_60 {dimension_numbers = #tpu.dot_dimension_numbers<[1], [0], [0], [1], [0, 0, 1, 1], [], []>} : vector<128x16xbf16>, vector<16x128xbf16>, vector<128x128xf32> -> vector<128x128xf32>
    %c1_61 = arith.constant 1 : index
    %c0_62 = arith.constant 0 : index
    %c0_63 = arith.constant 0 : index
    %85 = vector.load %arg6[%c1_61, %c0_62, %c0_63] : memref<2x128x16xbf16, #tpu.memory_space<vmem>>, vector<1x128x16xbf16>
    %86 = vector.shape_cast %85 : vector<1x128x16xbf16> to vector<128x16xbf16>
    %87 = arith.truncf %80 : vector<16x128xf32> to vector<16x128xbf16>
    %cst_64 = arith.constant dense<0.000000e+00> : vector<128x128xf32>
    %88 = tpu.matmul %86, %87, %cst_64 {dimension_numbers = #tpu.dot_dimension_numbers<[1], [0], [0], [1], [0, 0, 1, 1], [], []>} : vector<128x16xbf16>, vector<16x128xbf16>, vector<128x128xf32> -> vector<128x128xf32>
    %89 = arith.mulf %84, %88 : vector<128x128xf32>
    %cst_65 = arith.constant 1.000000e+00 : f32
    %90 = vector.broadcast %cst_65 : f32 to vector<8x128xf32>
    %cst_66 = arith.constant dense<0.000000e+00> : vector<8x128xf32>
    %91 = tpu.matmul %90, %89, %cst_66 {dimension_numbers = #tpu.dot_dimension_numbers<[1], [1], [0], [0], [0, 0, 1, 0], [], []>} : vector<8x128xf32>, vector<128x128xf32>, vector<8x128xf32> -> vector<8x128xf32>
    %c0_67 = arith.constant 0 : index
    %c0_68 = arith.constant 0 : index
    %92 = vector.load %arg7[%c0_67, %c0_68] : memref<8x128xf32, #tpu.memory_space<vmem>>, vector<8x128xf32>
    tpu.vector_store %arg7[%c0_67, %c0_68], %91 {strides = array<i32>} : memref<8x128xf32, #tpu.memory_space<vmem>>, vector<8x128xf32>,
    return
  }
}

</mosaic_0001>

<bundles_post_ra>
// kernel: fused_forward.1
= control target key start
LH: loop header
LB: loop body
LE: loop exit
PB: predicated region body
PF: predicated region fallthrough
CT: control target
= control target key end

     0   :  { %12 = vsyncpa [#allocation3], 0  ;;  %s1865_s0 = inlined_call_operand.vmem [shape: bf16[2,16,16], index: 0, kind: input, shape index: {}]   ;;  %s1866_s1 = inlined_call_operand.vmem [shape: bf16[2,16,128], index: 1, kind: input, shape index: {}]   ;;  %s1867_s2 = inlined_call_operand.vmem [shape: f32[2,16,128], index: 2, kind: input, shape index: {}]   ;;  %s1868_s3 = inlined_call_operand.vmem [shape: bf16[2,16,16], index: 3, kind: input, shape index: {}]   ;;  %s1869_s4 = inlined_call_operand.hbm [shape: bf16[8,128,128], index: 4, kind: input, shape index: {}]   ;;  %s1870_s5 = inlined_call_operand.vmem [shape: f32[8,128], index: 5, kind: input, shape index: {}]   ;;  %s1871_s6 = inlined_call_operand.vmem [shape: bf16[2,128,16], index: 6, kind: input, shape index: {}]   ;;  %s1872_s7 = inlined_call_operand.hbm [shape: f32[8,128], index: 7, kind: output, shape index: {}]  }
   0x1   :  { %13 = vsyncpa [#allocation4], 0  ;;  %s26_s26 = sshll.u32 %s1869_s4, 4  ;;  %s1697_s27 = smov [#allocation2]   ;;  %s27_s26 = int_to_ptr.hbm [resolvable:$true] %s26_s26 }
   0x2   :  { %s28_s28 = sshll.u32 %s1697_s27, 4  ;;  %s1698_s29 = smov 64   ;;  %s29_s28 = int_to_ptr.vmem [resolvable:$true] %s28_s28 }
   0x3   :  { %s1699_s30 = smov 4  }
   0x4   :  { %34 = dma.hbm_to_vmem [thread:$0]  %s27_s26, 8192, %s29_s28, [#allocation3], %s1698_s29, %s1698_s29, %s1699_s30  }
   0x5   :  { %1693 = dma.done.wait [#allocation3], 8192  }
   0x6   :  { %1694 = vsyncadd [#allocation3], 4294959104  ;;  %v1555_v0 = vld [vmem:[%s1866_s1] sm:$0xff]  ;;  %v1557_v1 = vld [vmem:[%s1866_s1 + $0x8] sm:$0xff]  ;;  %vm62_vm0 = vcmask 130048   ;;  %s1154_s30 = sshll.u32 %s1872_s7, 4  ;;  %s1155_s30 = int_to_ptr.hbm [resolvable:$true] %s1154_s30 }
   0x7   :  { %v1554_v2 = vld [vmem:[%s1865_s0] sm:$0xff]  ;;  %v1575_v3 = vld [vmem:[#allocation2 + $0x78] sm:$0xff]  ;;  %73 = vmatpush.bf16.msra.mxu1 %v1555_v0  ;;  %v1574_v4 = vld [vmem:[#allocation2 + $0x70] sm:$0xff] }
   0x8   :  { %228 = vmatpush.bf16.msra.mxu3 %v1575_v3  ;;  %v1573_v5 = vld [vmem:[#allocation2 + $0x68] sm:$0xff]  ;;  %v1572_v6 = vld [vmem:[#allocation2 + $0x60] sm:$0xff]  ;;  %v1571_v7 = vld [vmem:[#allocation2 + $0x58] sm:$0xff] }
   0x9   :  { %v1556_v8 = vld [vmem:[%s1865_s0 + $0x8] sm:$0xff]  ;;  %v1570_v9 = vld [vmem:[#allocation2 + $0x50] sm:$0xff]  ;;  %v1568_v11 = vld [vmem:[#allocation2 + $0x40] sm:$0xff] }
   0xa   :  { %1172 = vmatmul.msk.bf16.vlgmr.msra.gmra.mxu1 %vm62_vm0, %v1554_v2  ;;  %v1569_v10 = vld [vmem:[#allocation2 + $0x48] sm:$0xff]  ;;  %v1567_v13 = vld [vmem:[#allocation2 + $0x38] sm:$0xff]  ;;  %v1566_v14 = vld [vmem:[#allocation2 + $0x30] sm:$0xff] }
   0xb   :  { %110 = vmatpush.bf16.msrb.mxu1 %v1557_v1  ;;  %v49_v15 = vld [vmem:[%s1867_s2] sm:$0xff]  ;;  %v50_v16 = vld [vmem:[%s1867_s2 + $0x8] sm:$0xff]  ;;  %v1177_v25 = vld [vmem:[%s1867_s2 + $0x10] sm:$0xff] }
   0xc   :  { %229 = vmatpush.bf16.msra.mxu3 %v1574_v4  ;;  %v1565_v17 = vld [vmem:[#allocation2 + $0x28] sm:$0xff]  ;;  %v1564_v21 = vld [vmem:[#allocation2 + $0x20] sm:$0xff]  ;;  %v1178_v26 = vld [vmem:[%s1867_s2 + $0x18] sm:$0xff] }
   0xd   :  { %v1768_v23 = vld [vmem:[%s1868_s3 + $0x8] sm:$0xff]  ;;  %v1781_v31 = vld [vmem:[%s1868_s3] sm:$0xff]  ;;  %v1563_v32 = vld [vmem:[#allocation2 + $0x18] sm:$0xff] }
   0xe   :  { %v1583_v33 = vld [vmem:[#allocation2 + $0xb8] sm:$0xff]  ;;  %v1562_v34 = vld [vmem:[#allocation2 + $0x10] sm:$0xff]  ;;  %v1561_v36 = vld [vmem:[#allocation2 + $0x8] sm:$0xff] }
   0xf   :  { %v1582_v35 = vld [vmem:[#allocation2 + $0xb0] sm:$0xff]  ;;  %v1581_v37 = vld [vmem:[#allocation2 + $0xa8] sm:$0xff]  ;;  %v1560_v38 = vld [vmem:[#allocation2] sm:$0xff] }
  0x10   :  { %230 = vmatpush.bf16.msra.mxu3 %v1573_v5  ;;  %v1591_v39 = vld [vmem:[#allocation2 + $0xf8] sm:$0xff]  ;;  %v1580_v40 = vld [vmem:[#allocation2 + $0xa0] sm:$0xff]  ;;  %v1590_v41 = vld [vmem:[#allocation2 + $0xf0] sm:$0xff] }
  0x11   :  { %v1579_v42 = vld [vmem:[#allocation2 + $0x98] sm:$0xff]  ;;  %v1589_v43 = vld [vmem:[#allocation2 + $0xe8] sm:$0xff]  ;;  %v1578_v44 = vld [vmem:[#allocation2 + $0x90] sm:$0xff] }
  0x12   :  { %v1588_v45 = vld [vmem:[#allocation2 + $0xe0] sm:$0xff]  ;;  %v1577_v46 = vld [vmem:[#allocation2 + $0x88] sm:$0xff]  ;;  %v1587_v48 = vld [vmem:[#allocation2 + $0xd8] sm:$0xff] }
  0x13   :  { %v1576_v49 = vld [vmem:[#allocation2 + $0x80] sm:$0xff]  ;;  %v1586_v50 = vld [vmem:[#allocation2 + $0xd0] sm:$0xff]  ;;  %v1585_v51 = vld [vmem:[#allocation2 + $0xc8] sm:$0xff] }
  0x14   :  { %231 = vmatpush.bf16.msra.mxu3 %v1572_v6  ;;  %v1584_v54 = vld [vmem:[#allocation2 + $0xc0] sm:$0xff]  ;;  %v1607_v55 = vld [vmem:[#allocation2 + $0x178] sm:$0xff]  ;;  %v1606_v56 = vld [vmem:[#allocation2 + $0x170] sm:$0xff] }
  0x15   :  { %594 = vmatpush.bf16.msra.mxu0 %v1607_v55  ;;  %v1605_v58 = vld [vmem:[#allocation2 + $0x168] sm:$0xff]  ;;  %v1604_v59 = vld [vmem:[#allocation2 + $0x160] sm:$0xff]  ;;  %v1603_v62 = vld [vmem:[#allocation2 + $0x158] sm:$0xff] }
  0x16   :  { %v1623_v63 = vld [vmem:[#allocation2 + $0x1f8] sm:$0xff]  ;;  %v1602_v0 = vld [vmem:[#allocation2 + $0x150] sm:$0xff]  ;;  %v1601_v2 = vld [vmem:[#allocation2 + $0x148] sm:$0xff] }
  0x17   :  { %v1622_v1 = vld [vmem:[#allocation2 + $0x1f0] sm:$0xff]  ;;  %v1621_v3 = vld [vmem:[#allocation2 + $0x1e8] sm:$0xff]  ;;  %v1600_v4 = vld [vmem:[#allocation2 + $0x140] sm:$0xff] }
  0x18   :  { %232 = vmatpush.bf16.msra.mxu3 %v1571_v7  ;;  %v1620_v5 = vld [vmem:[#allocation2 + $0x1e0] sm:$0xff]  ;;  %v1619_v7 = vld [vmem:[#allocation2 + $0x1d8] sm:$0xff] }
  0x19   :  { %595 = vmatpush.bf16.msra.mxu0 %v1606_v56 }
  0x1a   :  { %1187 = vmatmul.msk.bf16.vlgmr.msrb.gmra.mxu1 %vm62_vm0, %v1556_v8  ;;  %v1618_v8 = vld [vmem:[#allocation2 + $0x1d0] sm:$0xff] }
  0x1c   :  { %233 = vmatpush.bf16.msra.mxu3 %v1570_v9 }
  0x1d   :  { %596 = vmatpush.bf16.msra.mxu0 %v1605_v58 }
  0x20   :  { %234 = vmatpush.bf16.msra.mxu3 %v1569_v10  ;;  %v1617_v10 = vld [vmem:[#allocation2 + $0x1c8] sm:$0xff] }
  0x21   :  { %597 = vmatpush.bf16.msra.mxu0 %v1604_v59 }
  0x24   :  { %235 = vmatpush.bf16.msra.mxu3 %v1568_v11  ;;  %v1616_v11 = vld [vmem:[#allocation2 + $0x1c0] sm:$0xff] }
  0x25   :  { %598 = vmatpush.bf16.msra.mxu0 %v1603_v62 }
  0x28   :  { %290 = vmatpush.bf16.msrb.mxu3 %v1567_v13  ;;  %v1788_v13 = vld [vmem:[%s1870_s5] sm:$0xff] }
  0x29   :  { %599 = vmatpush.bf16.msra.mxu0 %v1602_v0 }
  0x2c   :  { %291 = vmatpush.bf16.msrb.mxu3 %v1566_v14 }
  0x2d   :  { %600 = vmatpush.bf16.msra.mxu0 %v1601_v2 }
  0x30   :  { %292 = vmatpush.bf16.msrb.mxu3 %v1565_v17 }
  0x31   :  { %601 = vmatpush.bf16.msra.mxu0 %v1600_v4  ;;  %v1624_v4 = vld [vmem:[%s1871_s6] sm:$0xff] }
  0x34   :  { %293 = vmatpush.bf16.msrb.mxu3 %v1564_v21 }
  0x38   :  { %294 = vmatpush.bf16.msrb.mxu3 %v1563_v32 }
  0x3c   :  { %295 = vmatpush.bf16.msrb.mxu3 %v1562_v34 }
  0x40   :  { %296 = vmatpush.bf16.msrb.mxu3 %v1561_v36 }
  0x44   :  { %297 = vmatpush.bf16.msrb.mxu3 %v1560_v38  ;;  %v1598_v38 = vld [vmem:[#allocation2 + $0x130] sm:$0xff] }
  0x87   :  { %v75_v12 = vpop.f32.mrf.mxu1 }
  0x88   :  { %v76_v19 = vadd.f32 %v75_v12, %v49_v15  ;;  %v304_v15 = vperm.slane %v1788_v13, 0 }
  0x8f   :  { %v77_v18 = vpop.f32.mrf.mxu1 }
  0x90   :  { %v78_v20 = vadd.f32 %v77_v18, %v50_v16 }
  0x92   :  { %v179_v22 = vpack.c.bf16 %v78_v20, %v76_v19 }
  0x94   :  { %236 = vmatmul.bf16.vlgmr.msra.gmra.mxu3 %v179_v22  ;;  %358 = vmatpush.bf16.msra.mxu1 %v179_v22 }
  0x95   :  { %414 = vmatpush.bf16.msra.mxu3 %v1591_v39  ;;  %v1597_v39 = vld [vmem:[#allocation2 + $0x128] sm:$0xff] }
  0x97   :  { %v112_v24 = vpop.f32.mrf.mxu1  ;;  %1263 = vmatmul.msk.bf16.vlgmr.msra.gmra.mxu1 %vm62_vm0, %v1768_v23 }
  0x98   :  { %v113_v28 = vadd.f32 %v1177_v25, %v112_v24  ;;  %476 = vmatpush.bf16.msrb.mxu1 %v1583_v33 }
  0x99   :  { %415 = vmatpush.bf16.msra.mxu3 %v1590_v41  ;;  %v1615_v41 = vld [vmem:[#allocation2 + $0x1b8] sm:$0xff] }
  0x9c   :  { %477 = vmatpush.bf16.msrb.mxu1 %v1582_v35 }
  0x9d   :  { %416 = vmatpush.bf16.msra.mxu3 %v1589_v43  ;;  %v1594_v43 = vld [vmem:[#allocation2 + $0x110] sm:$0xff] }
  0x9f   :  { %v114_v27 = vpop.f32.mrf.mxu1 }
  0xa0   :  { %v115_v29 = vadd.f32 %v1178_v26, %v114_v27  ;;  %478 = vmatpush.bf16.msrb.mxu1 %v1581_v37  ;;  %v490_v27 = vperm.slane %v1788_v13, 1  ;;  %v1599_v37 = vld [vmem:[#allocation2 + $0x138] sm:$0xff] }
  0xa1   :  { %417 = vmatpush.bf16.msra.mxu3 %v1588_v45  ;;  %v1613_v45 = vld [vmem:[#allocation2 + $0x1a8] sm:$0xff] }
  0xa2   :  { %v155_v30 = vpack.c.bf16 %v115_v29, %v113_v28 }
  0xa4   :  { %171 = vmatpush.bf16.msra.mxu2 %v155_v30  ;;  %479 = vmatpush.bf16.msrb.mxu1 %v1580_v40  ;;  %v1596_v40 = vld [vmem:[#allocation2 + $0x120] sm:$0xff] }
  0xa5   :  { %418 = vmatpush.bf16.msra.mxu3 %v1587_v48  ;;  %v1610_v48 = vld [vmem:[#allocation2 + $0x190] sm:$0xff] }
  0xa7   :  { %1194 = vmatmul.msk.bf16.vlgmr.msra.gmra.mxu2 %vm62_vm0, %v1781_v31 }
  0xa8   :  { %480 = vmatpush.bf16.msrb.mxu1 %v1579_v42  ;;  %656 = vmatpush.bf16.msrb.mxu2 %v1599_v37  ;;  %v1595_v42 = vld [vmem:[#allocation2 + $0x118] sm:$0xff] }
  0xa9   :  { %419 = vmatpush.bf16.msra.mxu3 %v1586_v50  ;;  %v1608_v50 = vld [vmem:[#allocation2 + $0x180] sm:$0xff] }
  0xac   :  { %481 = vmatpush.bf16.msrb.mxu1 %v1578_v44  ;;  %657 = vmatpush.bf16.msrb.mxu2 %v1598_v38  ;;  %v1614_v44 = vld [vmem:[#allocation2 + $0x1b0] sm:$0xff] }
  0xad   :  { %420 = vmatpush.bf16.msra.mxu3 %v1585_v51 }
  0xb0   :  { %482 = vmatpush.bf16.msrb.mxu1 %v1577_v46  ;;  %658 = vmatpush.bf16.msrb.mxu2 %v1597_v39  ;;  %v1612_v46 = vld [vmem:[#allocation2 + $0x1a0] sm:$0xff] }
  0xb1   :  { %421 = vmatpush.bf16.msra.mxu3 %v1584_v54 }
  0xb4   :  { %483 = vmatpush.bf16.msrb.mxu1 %v1576_v49  ;;  %659 = vmatpush.bf16.msrb.mxu2 %v1596_v40  ;;  %v1609_v49 = vld [vmem:[#allocation2 + $0x188] sm:$0xff] }
  0xb8   :  { %770 = vmatpush.bf16.msra.mxu1 %v1623_v63  ;;  %660 = vmatpush.bf16.msrb.mxu2 %v1595_v42 }
  0xbc   :  { %771 = vmatpush.bf16.msra.mxu1 %v1622_v1  ;;  %661 = vmatpush.bf16.msrb.mxu2 %v1594_v43 }
  0xc0   :  { %772 = vmatpush.bf16.msra.mxu1 %v1621_v3 }
  0xc4   :  { %773 = vmatpush.bf16.msra.mxu1 %v1620_v5 }
  0xc8   :  { %774 = vmatpush.bf16.msra.mxu1 %v1619_v7  ;;  %v846_v7 = vperm.slane %v1788_v13, 3 }
  0xcc   :  { %775 = vmatpush.bf16.msra.mxu1 %v1618_v8 }
  0xd0   :  { %776 = vmatpush.bf16.msra.mxu1 %v1617_v10 }
  0xd4   :  { %777 = vmatpush.bf16.msra.mxu1 %v1616_v11 }
 0x114   :  { %v360_v47 = vpop.f32.mrf.mxu1 }
 0x117   :  { %v237_v6 = vpop.f32.mrf.mxu3 }
 0x11c   :  { %v362_v52 = vpop.f32.mrf.mxu1 }
 0x11d   :  { %v365_v53 = vpack.c.bf16 %v362_v52, %v360_v47  ;;  %v1611_v47 = vld [vmem:[#allocation2 + $0x198] sm:$0xff] }
 0x11f   :  { %484 = vmatmul.bf16.vlgmr.msrb.gmra.mxu1 %v365_v53  ;;  %v239_v9 = vpop.f32.mrf.mxu3 }
 0x12a   :  { %v173_v57 = vpop.f32.mrf.mxu2 }
 0x132   :  { %v175_v60 = vpop.f32.mrf.mxu2 }
 0x133   :  { %v178_v61 = vpack.c.bf16 %v175_v60, %v173_v57  ;;  %v670_v60 = vperm.slane %v1788_v13, 2  ;;  %v1633_v13 = vld [vmem:[%s1871_s6 + $0x48] sm:$0xff] }
 0x135   :  { %298 = vmatmul.bf16.vlgmr.msrb.gmra.mxu3 %v178_v61 }
 0x145   :  { %422 = vmatmul.bf16.vlgmr.msra.gmra.mxu3 %v155_v30 }
 0x19c   :  { %v485_v22 = vpop.f32.mrf.mxu1 }
 0x1a4   :  { %v487_v28 = vpop.f32.mrf.mxu1 }
 0x1b8   :  { %v299_v12 = vpop.f32.mrf.mxu3 }
 0x1b9   :  { %v300_v14 = vadd.f32 %v299_v12, %v237_v6 }
 0x1bb   :  { %v305_v17 = vadd.f32 %v304_v15, %v300_v14 }
 0x1bd   :  { %v307_v20 = vmax.f32 %v305_v17, 0.0  ;;  %v1626_v17 = vld [vmem:[%s1871_s6 + $0x10] sm:$0xff] }
 0x1c0   :  { %v301_v16 = vpop.f32.mrf.mxu3 }
 0x1c1   :  { %v302_v18 = vadd.f32 %v301_v16, %v239_v9  ;;  %v1625_v16 = vld [vmem:[%s1871_s6 + $0x8] sm:$0xff] }
 0x1c3   :  { %v306_v19 = vadd.f32 %v304_v15, %v302_v18  ;;  %v1632_v15 = vld [vmem:[%s1871_s6 + $0x40] sm:$0xff]  ;;  %v1634_v18 = vld [vmem:[%s1871_s6 + $0x50] sm:$0xff] }
 0x1c5   :  { %v308_v21 = vmax.f32 %v306_v19, 0.0  ;;  %v1627_v19 = vld [vmem:[%s1871_s6 + $0x18] sm:$0xff] }
 0x1c7   :  { %v545_v24 = vpack.c.bf16 %v308_v21, %v307_v20  ;;  %v1635_v20 = vld [vmem:[%s1871_s6 + $0x58] sm:$0xff]  ;;  %v1628_v21 = vld [vmem:[%s1871_s6 + $0x20] sm:$0xff] }
 0x1c8   :  { %v423_v25 = vpop.f32.mrf.mxu3 }
 0x1c9   :  { %602 = vmatmul.bf16.vlgmr.msra.gmra.mxu0 %v545_v24  ;;  %v486_v26 = vadd.f32 %v485_v22, %v423_v25  ;;  %v1636_v22 = vld [vmem:[%s1871_s6 + $0x60] sm:$0xff]  ;;  %v1637_v25 = vld [vmem:[%s1871_s6 + $0x68] sm:$0xff] }
 0x1cb   :  { %v491_v30 = vadd.f32 %v490_v27, %v486_v26  ;;  %v1630_v26 = vld [vmem:[%s1871_s6 + $0x30] sm:$0xff] }
 0x1cd   :  { %v493_v34 = vmax.f32 %v491_v30, 0.0 }
 0x1d0   :  { %v425_v29 = vpop.f32.mrf.mxu3 }
 0x1d1   :  { %v488_v32 = vadd.f32 %v487_v28, %v425_v29  ;;  %v1631_v28 = vld [vmem:[%s1871_s6 + $0x38] sm:$0xff] }
 0x1d2   :  { %v1639_v29 = vld [vmem:[%s1871_s6 + $0x78] sm:$0xff] }
 0x1d3   :  { %v492_v33 = vadd.f32 %v490_v27, %v488_v32  ;;  %v1638_v27 = vld [vmem:[%s1871_s6 + $0x70] sm:$0xff] }
 0x1d5   :  { %v494_v35 = vmax.f32 %v492_v33, 0.0 }
 0x1d7   :  { %v529_v36 = vpack.c.bf16 %v494_v35, %v493_v34 }
 0x1d9   :  { %537 = vmatpush.bf16.msrb.mxu3 %v529_v36  ;;  %778 = vmatmul.bf16.vlgmr.msra.gmra.mxu1 %v529_v36 }
 0x1dc   :  { %1328 = vmatmul.msk.bf16.vlgmr.msrb.gmra.mxu3 %vm62_vm0, %v1781_v31  ;;  %v1593_v31 = vld [vmem:[#allocation2 + $0x108] sm:$0xff] }
 0x1dd   :  { %714 = vmatpush.bf16.msra.mxu3 %v545_v24  ;;  %662 = vmatpush.bf16.msrb.mxu2 %v1593_v31  ;;  %v1629_v24 = vld [vmem:[%s1871_s6 + $0x28] sm:$0xff]  ;;  %s1701_s6 = smov [#allocation5]  }
 0x1de   :  { %s1152_s27 = sshll.u32 %s1701_s6, 4  ;;  %s1153_s27 = int_to_ptr.vmem [resolvable:$true] %s1152_s27 }
 0x1e1   :  { %832 = vmatpush.bf16.msrb.mxu3 %v1615_v41 }
 0x1e5   :  { %833 = vmatpush.bf16.msrb.mxu3 %v1614_v44 }
 0x1e9   :  { %834 = vmatpush.bf16.msrb.mxu3 %v1613_v45 }
 0x1ec   :  { %1393 = vmatmul.msk.bf16.vlgmr.msra.gmra.mxu3 %vm62_vm0, %v1768_v23  ;;  %v1592_v23 = vld [vmem:[#allocation2 + $0x100] sm:$0xff] }
 0x1ed   :  { %663 = vmatpush.bf16.msrb.mxu2 %v1592_v23  ;;  %835 = vmatpush.bf16.msrb.mxu3 %v1612_v46 }
 0x1f1   :  { %836 = vmatpush.bf16.msrb.mxu3 %v1611_v47 }
 0x1f5   :  { %837 = vmatpush.bf16.msrb.mxu3 %v1610_v48 }
 0x1f9   :  { %838 = vmatpush.bf16.msrb.mxu3 %v1609_v49 }
 0x1fd   :  { %839 = vmatpush.bf16.msrb.mxu3 %v1608_v50 }
 0x246   :  { %v603_v57 = vpop.f32.mrf.mxu0 }
 0x24e   :  { %v605_v61 = vpop.f32.mrf.mxu0 }
 0x256   :  { %v779_v3 = vpop.f32.mrf.mxu1 }
 0x25e   :  { %v781_v8 = vpop.f32.mrf.mxu1 }
 0x25f   :  { %v539_v51 = vpop.f32.mrf.mxu3 }
 0x267   :  { %v541_v52 = vpop.f32.mrf.mxu3 }
 0x268   :  { %v544_v53 = vpack.c.bf16 %v541_v52, %v539_v51 }
 0x26a   :  { %664 = vmatmul.bf16.vlgmr.msrb.gmra.mxu2 %v544_v53 }
 0x26f   :  { %v716_v54 = vpop.f32.mrf.mxu3 }
 0x277   :  { %v718_v55 = vpop.f32.mrf.mxu3 }
 0x278   :  { %v721_v56 = vpack.c.bf16 %v718_v55, %v716_v54 }
 0x27a   :  { %840 = vmatmul.bf16.vlgmr.msrb.gmra.mxu3 %v721_v56 }
 0x2ed   :  { %v665_v58 = vpop.f32.mrf.mxu2 }
 0x2ee   :  { %v666_v59 = vadd.f32 %v665_v58, %v603_v57 }
 0x2f0   :  { %v671_v0 = vadd.f32 %v670_v60, %v666_v59 }
 0x2f5   :  { %v667_v62 = vpop.f32.mrf.mxu2 }
 0x2f6   :  { %v668_v63 = vadd.f32 %v667_v62, %v605_v61 }
 0x2f8   :  { %v672_v1 = vadd.f32 %v670_v60, %v668_v63 }
 0x2fa   :  { %v865_v2 = vpack.c.bf16 %v672_v1, %v671_v0 }
 0x2fc   :  { %937 = vmatpush.bf16.msrb.mxu0 %v865_v2 }
 0x2fd   :  { %v841_v5 = vpop.f32.mrf.mxu3 }
 0x2fe   :  { %v842_v6 = vadd.f32 %v841_v5, %v779_v3 }
 0x2ff   :  { %1490 = vmatmul.msk.bf16.vlgmr.msrb.gmra.mxu0 %vm62_vm0, %v1624_v4 }
 0x300   :  { %v847_v11 = vadd.f32 %v846_v7, %v842_v6 }
 0x305   :  { %v843_v9 = vpop.f32.mrf.mxu3 }
 0x306   :  { %v844_v10 = vadd.f32 %v843_v9, %v781_v8 }
 0x308   :  { %v848_v12 = vadd.f32 %v846_v7, %v844_v10 }
 0x30a   :  { %v996_v14 = vpack.c.bf16 %v848_v12, %v847_v11 }
 0x30c   :  { %1068 = vmatpush.bf16.msra.mxu2 %v996_v14  ;;  %v1700_v14 = vmov 1.0  }
 0x30f   :  { %1546 = vmatmul.msk.bf16.vlgmr.msra.gmra.mxu2 %vm62_vm0, %v1632_v15  ;;  %1491 = vmatmul.msk.bf16.gmra.mxu0 %vm62_vm0, %v1625_v16 }
 0x31f   :  { %1547 = vmatmul.msk.bf16.gmra.mxu2 %vm62_vm0, %v1633_v13  ;;  %1492 = vmatmul.msk.bf16.gmra.mxu0 %vm62_vm0, %v1626_v17 }
 0x32f   :  { %1548 = vmatmul.msk.bf16.gmra.mxu2 %vm62_vm0, %v1634_v18  ;;  %1493 = vmatmul.msk.bf16.gmra.mxu0 %vm62_vm0, %v1627_v19 }
 0x33f   :  { %1549 = vmatmul.msk.bf16.gmra.mxu2 %vm62_vm0, %v1635_v20  ;;  %1494 = vmatmul.msk.bf16.gmra.mxu0 %vm62_vm0, %v1628_v21 }
 0x34f   :  { %1550 = vmatmul.msk.bf16.gmra.mxu2 %vm62_vm0, %v1636_v22  ;;  %1495 = vmatmul.msk.bf16.gmra.mxu0 %vm62_vm0, %v1629_v24 }
 0x35f   :  { %1551 = vmatmul.msk.bf16.gmra.mxu2 %vm62_vm0, %v1637_v25  ;;  %1496 = vmatmul.msk.bf16.gmra.mxu0 %vm62_vm0, %v1630_v26 }
 0x36f   :  { %1552 = vmatmul.msk.bf16.gmra.mxu2 %vm62_vm0, %v1638_v27  ;;  %1497 = vmatmul.msk.bf16.gmra.mxu0 %vm62_vm0, %v1631_v28 }
 0x37c   :  { %v939_v30 = vpop.f32.mrf.mxu0 }
 0x37f   :  { %1553 = vmatmul.msk.bf16.gmra.mxu2 %vm62_vm0, %v1639_v29 }
 0x384   :  { %v941_v32 = vpop.f32.mrf.mxu0 }
 0x38c   :  { %v944_v33 = vpop.f32.mrf.mxu0 }
 0x392   :  { %v1070_v34 = vpop.f32.mrf.mxu2 }
 0x393   :  { %v1110_v35 = vmul.f32 %v1070_v34, %v939_v30 }
 0x394   :  { %v946_v36 = vpop.f32.mrf.mxu0 }
 0x39a   :  { %v1072_v37 = vpop.f32.mrf.mxu2 }
 0x39b   :  { %v1111_v38 = vmul.f32 %v1072_v37, %v941_v32 }
 0x39c   :  { %v949_v39 = vpop.f32.mrf.mxu0 }
 0x3a2   :  { %v1075_v40 = vpop.f32.mrf.mxu2 }
 0x3a3   :  { %v1112_v41 = vmul.f32 %v1075_v40, %v944_v33 }
 0x3a4   :  { %v951_v42 = vpop.f32.mrf.mxu0 }
 0x3aa   :  { %v1077_v43 = vpop.f32.mrf.mxu2 }
 0x3ab   :  { %v1113_v44 = vmul.f32 %v1077_v43, %v946_v36 }
 0x3ac   :  { %v954_v31 = vpop.f32.mrf.mxu0 }
 0x3b2   :  { %v1080_v45 = vpop.f32.mrf.mxu2 }
 0x3b3   :  { %v1114_v23 = vmul.f32 %v1080_v45, %v949_v39 }
 0x3b4   :  { %v956_v47 = vpop.f32.mrf.mxu0 }
 0x3ba   :  { %v1082_v46 = vpop.f32.mrf.mxu2 }
 0x3bb   :  { %v1115_v48 = vmul.f32 %v1082_v46, %v951_v42 }
 0x3bc   :  { %v959_v51 = vpop.f32.mrf.mxu0 }
 0x3c2   :  { %v1085_v49 = vpop.f32.mrf.mxu2 }
 0x3c3   :  { %v1116_v50 = vmul.f32 %v1085_v49, %v954_v31 }
 0x3c4   :  { %v961_v54 = vpop.f32.mrf.mxu0 }
 0x3ca   :  { %v1087_v52 = vpop.f32.mrf.mxu2 }
 0x3cb   :  { %v1117_v53 = vmul.f32 %v1087_v52, %v956_v47 }
 0x3cc   :  { %v964_v57 = vpop.f32.mrf.mxu0 }
 0x3d2   :  { %v1090_v55 = vpop.f32.mrf.mxu2 }
 0x3d3   :  { %v1118_v56 = vmul.f32 %v1090_v55, %v959_v51 }
 0x3d4   :  { %v966_v61 = vpop.f32.mrf.mxu0 }
 0x3da   :  { %v1092_v58 = vpop.f32.mrf.mxu2 }
 0x3db   :  { %v1119_v59 = vmul.f32 %v1092_v58, %v961_v54 }
 0x3dc   :  { %v969_v63 = vpop.f32.mrf.mxu0 }
 0x3e2   :  { %v1095_v60 = vpop.f32.mrf.mxu2 }
 0x3e3   :  { %v1120_v12 = vmul.f32 %v1095_v60, %v964_v57 }
 0x3e4   :  { %v971_v1 = vpop.f32.mrf.mxu0 }
 0x3ea   :  { %v1097_v62 = vpop.f32.mrf.mxu2 }
 0x3eb   :  { %v1121_v11 = vmul.f32 %v1097_v62, %v966_v61 }
 0x3ec   :  { %v974_v3 = vpop.f32.mrf.mxu0 }
 0x3f2   :  { %v1100_v0 = vpop.f32.mrf.mxu2 }
 0x3f3   :  { %v1122_v10 = vmul.f32 %v1100_v0, %v969_v63 }
 0x3f4   :  { %v976_v5 = vpop.f32.mrf.mxu0 }
 0x3fa   :  { %v1102_v2 = vpop.f32.mrf.mxu2 }
 0x3fb   :  { %v1123_v9 = vmul.f32 %v1102_v2, %v971_v1 }
 0x402   :  { %v1105_v4 = vpop.f32.mrf.mxu2 }
 0x403   :  { %v1124_v8 = vmul.f32 %v1105_v4, %v974_v3 }
 0x40a   :  { %v1107_v6 = vpop.f32.mrf.mxu2 }
 0x40b   :  { %v1125_v7 = vmul.f32 %v1107_v6, %v976_v5 }
 0x40d   :  { %1126 = vmatpush.xpose.msrb.mxu1 %v1125_v7 }
 0x411   :  { %1127 = vmatpush.xpose.msrb.mxu1 %v1124_v8 }
 0x415   :  { %1128 = vmatpush.xpose.msrb.mxu1 %v1123_v9 }
 0x419   :  { %1129 = vmatpush.xpose.msrb.mxu1 %v1122_v10 }
 0x41d   :  { %1130 = vmatpush.xpose.msrb.mxu1 %v1121_v11 }
 0x421   :  { %1131 = vmatpush.xpose.msrb.mxu1 %v1120_v12 }
 0x425   :  { %1132 = vmatpush.xpose.msrb.mxu1 %v1119_v59 }
 0x429   :  { %1133 = vmatpush.xpose.msrb.mxu1 %v1118_v56 }
 0x42d   :  { %1134 = vmatpush.xpose.msrb.mxu1 %v1117_v53 }
 0x431   :  { %1135 = vmatpush.xpose.msrb.mxu1 %v1116_v50 }
 0x435   :  { %1136 = vmatpush.xpose.msrb.mxu1 %v1115_v48 }
 0x439   :  { %1137 = vmatpush.xpose.msrb.mxu1 %v1114_v23 }
 0x43d   :  { %1138 = vmatpush.xpose.msrb.mxu1 %v1113_v44 }
 0x441   :  { %1139 = vmatpush.xpose.msrb.mxu1 %v1112_v41 }
 0x445   :  { %1140 = vmatpush.xpose.msrb.mxu1 %v1111_v38 }
 0x449   :  { %1141 = vmatpush.xpose.msrb.mxu1 %v1110_v35 }
 0x44c   :  { %1142 = vmatmul.f32.vlgmr.msrb.gmra.mxu1 %v1700_v14 }
 0x4c9   :  { %v1143_v15 = vpop.f32.mrf.mxu1 }
 0x4ca   :  { %1146 = vst [vmem:[#allocation5] sm:$0xff] %v1143_v15 }
 0x4cb   :  { %1157 = dma.vmem_to_hbm [thread:$0]  %s1153_s27, 128, %s1155_s30, [#allocation4]  }
 0x4cc   :  { %1695 = dma.done.wait [#allocation4], 128  }
 0x4cd   :  { %1696 = vsyncadd [#allocation4], 4294967168 }
 0x4ce   :  { %1162 = vsyncpa [#allocation3], 1 }
 0x4cf   :  { %1163 = vsyncpa [#allocation4], 1 }

</bundles_post_ra>
